<compile_context>
chip_gen: v7x
topology: tpu7x:2x2x1
jax: 0.10.0
libtpu: 0.0.40
codegen_flags: <defaults>
</compile_context>

<pallas_src>
import functools

import jax
import jax.numpy as jnp
from jax.experimental import pallas as pl
from jax.experimental.pallas import tpu as pltpu


def _conv_bn_relu_kernel(x_ref, w_ref, b_ref, o_ref, *, bt, Hg, L):
    # x_ref: (bt, Hg, L)   lane-dense activations, L = G*W*C (multiple of 128)
    # w_ref: (3, L, L)     block-banded weights: [prev-group, same-group, next-group]
    # b_ref: (1, L)        folded bias (conv bias + BN shift), f32
    # o_ref: (bt, Hg, L)
    M = bt * Hg
    x = x_ref[...].reshape(M, L)

    # Neighbour row-groups via XLU roll + O(M) boundary mask (replaces the old
    # O(M^2) row-shift matmuls).  Image boundaries inside a multi-image block
    # coincide with group boundaries, so the same mask handles both.
    r = jax.lax.broadcasted_iota(jnp.int32, (M, 1), 0)
    x_prev = pltpu.roll(x, shift=1, axis=0)          # row r sees group r-1
    x_next = pltpu.roll(x, shift=M - 1, axis=0)      # row r sees group r+1
    x_prev = jnp.where(r % Hg == 0, jnp.zeros_like(x_prev), x_prev)
    x_next = jnp.where(r % Hg == Hg - 1, jnp.zeros_like(x_next), x_next)

    # Three real tap matmuls on the MXU (K = N = L, f32 accumulation).
    acc = jnp.dot(x, w_ref[1], preferred_element_type=jnp.float32)
    acc = acc + jnp.dot(x_prev, w_ref[0], preferred_element_type=jnp.float32)
    acc = acc + jnp.dot(x_next, w_ref[2], preferred_element_type=jnp.float32)

    # Epilogue: folded-BN bias + ReLU, f32.
    y = jnp.maximum(acc + b_ref[...], 0.0)
    o_ref[...] = y.reshape(bt, Hg, L).astype(o_ref.dtype)


def _pick_row_group(WC, H):
    """Smallest G with (G*WC) % 128 == 0 and H % G == 0; fall back to 1."""
    g = 1
    while g <= H and ((WC * g) % 128 != 0 or H % g != 0):
        g += 1
    if g > H or (WC * g) % 128 != 0 or H % g != 0:
        return 1
    return g


def depthwise_convolution_forward(x_nchw, conv_w, conv_b, bn_gamma, bn_beta,
                                  bn_mean, bn_var, eps=1e-5,
                                  batch_tile=None, row_group=None,
                                  compute_dtype=jnp.float32):
    """Forward pass matching DepthwiseConvolution (stride=(1,1), inference BN).

    x_nchw : (N, C, H, W) float32
    conv_w : (Cout, Cin, 3, 3) float32 (PyTorch OIHW layout)
    """
    N, C, H, W = x_nchw.shape
    WC = W * C

    # Row grouping: pack G rows per lane-row so the lane width is a multiple
    # of 128.  (On v6e/v7x, row_group can be raised to reach 256 lanes.)
    G = row_group if row_group is not None else _pick_row_group(WC, H)
    assert H % G == 0, "row_group must divide H"
    Hg = H // G
    L = G * WC

    # batch_tile: ~1 MiB per step, but keep grid length >= 2 (v7x: 2 TCs).
    itemsize = jnp.dtype(compute_dtype).itemsize
    if batch_tile is None:
        per_img_bytes = Hg * L * (itemsize + 4)           # input + f32 output
        target = max(1, (1 << 20) // max(per_img_bytes, 1))
        cap = max(1, N // 2)
        batch_tile = max(1, min(target, cap))
        while N % batch_tile:
            batch_tile -= 1
    bt = batch_tile
    assert N % bt == 0, "batch_tile must divide N"

    # ---- glue: fold BN into conv weights/bias ----
    inv_std = jax.lax.rsqrt(bn_var + eps)
    scale = bn_gamma * inv_std                             # per-cout scale
    bias = bn_beta + scale * (conv_b - bn_mean)            # folded bias

    # (Cout, Cin, kh, kw) -> (kh, kw, Cin, Cout), BN scale folded into cout.
    w_hwio = jnp.transpose(conv_w, (2, 3, 1, 0)) * scale[None, None, None, :]

    # ---- block-banded weights over the (G rows x W x C) lane slab ----
    # w_band[s][(ri_in*W + w_in)*C + cin, (ri_out*W + w_out)*C + cout]
    #   = w_hwio[kh, kw, cin, cout]   with kh = (s-1)*G + ri_in - ri_out + 1,
    #     w_in = w_out + kw - 1 (out-of-range w_in rows are zero = W padding).
    # s = 0: previous row-group, 1: same group, 2: next group.
    w_band = jnp.zeros((3, L, L), jnp.float32)
    for s in range(3):
        goff = s - 1
        for ri_in in range(G):
            for ri_out in range(G):
                kh = goff * G + ri_in - ri_out + 1
                if not (0 <= kh <= 2):
                    continue
                for kw in range(3):
                    shift_w = jnp.eye(W, k=1 - kw, dtype=jnp.float32)
                    blk = jnp.kron(shift_w, w_hwio[kh, kw])        # (WC, WC)
                    w_band = w_band.at[
                        s,
                        ri_in * WC:(ri_in + 1) * WC,
                        ri_out * WC:(ri_out + 1) * WC].add(blk)

    bias_row = jnp.tile(bias, W * G).reshape(1, L).astype(jnp.float32)

    # Lane-dense activations: NCHW -> NHWC -> (N, H/G, G*W*C)
    x2d = jnp.transpose(x_nchw, (0, 2, 3, 1)).reshape(N, Hg, L)

    # Optional bf16 matmul inputs (halves HBM read traffic; accumulation f32).
    x2d = x2d.astype(compute_dtype)
    w_band = w_band.astype(compute_dtype)

    # VMEM budget from actual block bytes (safe on v7x's 64 MiB physical VMEM).
    blk_in = bt * Hg * L * itemsize
    blk_out = bt * Hg * L * 4
    fixed = 3 * L * L * itemsize + L * 4
    vmem_limit = 3 * (blk_in + blk_out) + 2 * fixed
    vmem_limit = int(min(48 * 1024 * 1024, max(4 * 1024 * 1024, vmem_limit)))

    kernel = functools.partial(_conv_bn_relu_kernel, bt=bt, Hg=Hg, L=L)

    out = pl.pallas_call(
        kernel,
        out_shape=jax.ShapeDtypeStruct((N, Hg, L), jnp.float32),
        grid_spec=pltpu.PrefetchScalarGridSpec(
            num_scalar_prefetch=0,
            grid=(N // bt,),
            in_specs=[
                pl.BlockSpec((bt, Hg, L), lambda n: (n, 0, 0)),
                pl.BlockSpec((3, L, L), lambda n: (0, 0, 0)),
                pl.BlockSpec((1, L), lambda n: (0, 0)),
            ],
            out_specs=pl.BlockSpec((bt, Hg, L), lambda n: (n, 0, 0)),
        ),
        compiler_params=pltpu.CompilerParams(
            dimension_semantics=("parallel",),
            vmem_limit_bytes=vmem_limit,
        ),
    )(x2d, w_band, bias_row)

    # (N, H/G, G*W*C) -> NCHW
    return jnp.transpose(out.reshape(N, H, W, C), (0, 3, 1, 2))


def _reference(x_nchw, conv_w, conv_b, bn_gamma, bn_beta, bn_mean, bn_var,
               eps=1e-5):
    y = jax.lax.conv_general_dilated(
        x_nchw, conv_w, window_strides=(1, 1), padding=((1, 1), (1, 1)),
        dimension_numbers=("NCHW", "OIHW", "NCHW"))
    y = y + conv_b.reshape(1, -1, 1, 1)
    inv_std = 1.0 / jnp.sqrt(bn_var + eps)
    y = (y - bn_mean.reshape(1, -1, 1, 1)) * (bn_gamma * inv_std).reshape(1, -1, 1, 1)
    y = y + bn_beta.reshape(1, -1, 1, 1)
    return jnp.maximum(y, 0.0)


if __name__ == "__main__":
    key = jax.random.PRNGKey(0)
    kx, kw_, kb, kg, kbeta, km, kv = jax.random.split(key, 7)

    N, C, H, W = 2, 4, 16, 16          # size = C = 4

    x = jax.random.normal(kx, (N, C, H, W), dtype=jnp.float32)

    # deterministic parameters (Conv2d(size, size, 3, 3) + BatchNorm2d(size))
    conv_w = jax.random.normal(kw_, (C, C, 3, 3), dtype=jnp.float32) * 0.1
    conv_b = jax.random.normal(kb, (C,), dtype=jnp.float32) * 0.1
    bn_gamma = 1.0 + 0.1 * jax.random.normal(kg, (C,), dtype=jnp.float32)
    bn_beta = 0.1 * jax.random.normal(kbeta, (C,), dtype=jnp.float32)
    bn_mean = 0.1 * jax.random.normal(km, (C,), dtype=jnp.float32)
    bn_var = jnp.abs(jax.random.normal(kv, (C,), dtype=jnp.float32)) + 0.5

    ref = _reference(x, conv_w, conv_b, bn_gamma, bn_beta, bn_mean, bn_var)

    # A) default: G=2 row grouping (L=128 lanes), auto batch_tile (grid >= 2), f32.
    out = depthwise_convolution_forward(x, conv_w, conv_b, bn_gamma, bn_beta,
                                        bn_mean, bn_var)
    out = jax.block_until_ready(out)
    assert out.shape == (N, C, H, W)
    assert jnp.allclose(out, ref, rtol=1e-4, atol=1e-4), "mismatch vs reference (f32)"

    # B) larger batch with batch_tile=2: multi-image block exercises the roll +
    #    boundary-mask path across image boundaries inside one grid step.
    N2 = 8
    x_big = jax.random.normal(jax.random.PRNGKey(1), (N2, C, H, W), jnp.float32)
    ref_big = _reference(x_big, conv_w, conv_b, bn_gamma, bn_beta, bn_mean, bn_var)
    out_big = depthwise_convolution_forward(x_big, conv_w, conv_b, bn_gamma,
                                            bn_beta, bn_mean, bn_var,
                                            batch_tile=2)
    out_big = jax.block_until_ready(out_big)
    assert jnp.allclose(out_big, ref_big, rtol=1e-4, atol=1e-4), "mismatch (batch_tile=2)"

    # C) bf16 matmul inputs (HBM-bound advice for v5e/v6e); epilogue stays f32.
    out_bf16 = depthwise_convolution_forward(x, conv_w, conv_b, bn_gamma, bn_beta,
                                             bn_mean, bn_var,
                                             compute_dtype=jnp.bfloat16)
    out_bf16 = jax.block_until_ready(out_bf16)
    assert jnp.allclose(out_bf16, ref, rtol=5e-2, atol=5e-2), "mismatch (bf16)"

    print("KERNEL_OK")
</pallas_src>

<mosaic_0001>
module attributes {stable_mosaic.version = 11 : i64} {
  func.func @_conv_bn_relu_kernel(%arg0: i32, %arg1: memref<1x8x128xf32, #tpu.memory_space<vmem>>, %arg2: memref<3x128x128xf32, #tpu.memory_space<vmem>>, %arg3: memref<1x128xf32, #tpu.memory_space<vmem>>, %arg4: memref<1x8x128xf32, #tpu.memory_space<vmem>>) attributes {dimension_semantics = [#tpu.dimension_semantics<parallel>], iteration_bounds = array<i64: 2>, scalar_prefetch = 0 : i64, scratch_operands = 0 : i64, tpu.core_type = #tpu.core_type<tc>, window_params = [{transform_indices = @transform_0, window_bounds = array<i64: 1, 8, 128>}, {pipeline_mode = #tpu.pipeline_mode<synchronous>, transform_indices = @transform_1, window_bounds = array<i64: 3, 128, 128>}, {pipeline_mode = #tpu.pipeline_mode<synchronous>, transform_indices = @transform_2, window_bounds = array<i64: 1, 128>}, {transform_indices = @transform_3, window_bounds = array<i64: 1, 8, 128>}]} {
    %c0 = arith.constant 0 : index
    %c0_0 = arith.constant 0 : index
    %c0_1 = arith.constant 0 : index
    %0 = vector.load %arg1[%c0, %c0_0, %c0_1] : memref<1x8x128xf32, #tpu.memory_space<vmem>>, vector<1x8x128xf32>
    %1 = vector.shape_cast %0 : vector<1x8x128xf32> to vector<8x128xf32>
    %2 = tpu.iota {dimensions = array<i32: 0>} : vector<8x1xi32>
    %c1_i32 = arith.constant 1 : i32
    %3 = tpu.dynamic_rotate %1 by %c1_i32 dim 0 : vector<8x128xf32>, i32 -> vector<8x128xf32>
    %c7_i32 = arith.constant 7 : i32
    %4 = tpu.dynamic_rotate %1 by %c7_i32 dim 0 : vector<8x128xf32>, i32 -> vector<8x128xf32>
    %c8_i32 = arith.constant 8 : i32
    %c0_i32 = arith.constant 0 : i32
    %5 = arith.cmpi eq, %c8_i32, %c0_i32 : i32
    %c1_i32_2 = arith.constant 1 : i32
    %6 = arith.select %5, %c1_i32_2, %c8_i32 : i32
    %7 = vector.broadcast %6 : i32 to vector<8x1xi32>
    %8 = arith.remsi %2, %7 : vector<8x1xi32>
    %c0_i32_3 = arith.constant 0 : i32
    %9 = vector.broadcast %c0_i32_3 : i32 to vector<8x1xi32>
    %10 = arith.cmpi ne, %8, %9 : vector<8x1xi32>
    %c0_i32_4 = arith.constant 0 : i32
    %11 = vector.broadcast %c0_i32_4 : i32 to vector<8x1xi32>
    %12 = arith.cmpi slt, %8, %11 : vector<8x1xi32>
    %c0_i32_5 = arith.constant 0 : i32
    %13 = arith.cmpi slt, %6, %c0_i32_5 : i32
    %14 = vector.broadcast %13 : i1 to vector<8x1xi1>
    %15 = vector.broadcast %14 : vector<8x1xi1> to vector<8x1xi1>
    %16 = arith.xori %12, %15 : vector<8x1xi1>
    %17 = arith.andi %16, %10 : vector<8x1xi1>
    %18 = vector.broadcast %6 : i32 to vector<8x1xi32>
    %19 = arith.addi %8, %18 : vector<8x1xi32>
    %20 = arith.select %17, %19, %8 : vector<8x1xi1>, vector<8x1xi32>
    %c0_i32_6 = arith.constant 0 : i32
    %21 = vector.broadcast %c0_i32_6 : i32 to vector<8x1xi32>
    %22 = arith.cmpi eq, %20, %21 : vector<8x1xi32>
    %cst = arith.constant 0.000000e+00 : f32
    %23 = vector.broadcast %cst : f32 to vector<8x128xf32>
    %24 = vector.shape_cast %22 : vector<8x1xi1> to vector<8x1xi1>
    %25 = vector.broadcast %24 : vector<8x1xi1> to vector<8x128xi1>
    %26 = arith.select %25, %23, %3 : vector<8x128xi1>, vector<8x128xf32>
    %c8_i32_7 = arith.constant 8 : i32
    %c0_i32_8 = arith.constant 0 : i32
    %27 = arith.cmpi eq, %c8_i32_7, %c0_i32_8 : i32
    %c1_i32_9 = arith.constant 1 : i32
    %28 = arith.select %27, %c1_i32_9, %c8_i32_7 : i32
    %29 = vector.broadcast %28 : i32 to vector<8x1xi32>
    %30 = arith.remsi %2, %29 : vector<8x1xi32>
    %c0_i32_10 = arith.constant 0 : i32
    %31 = vector.broadcast %c0_i32_10 : i32 to vector<8x1xi32>
    %32 = arith.cmpi ne, %30, %31 : vector<8x1xi32>
    %c0_i32_11 = arith.constant 0 : i32
    %33 = vector.broadcast %c0_i32_11 : i32 to vector<8x1xi32>
    %34 = arith.cmpi slt, %30, %33 : vector<8x1xi32>
    %c0_i32_12 = arith.constant 0 : i32
    %35 = arith.cmpi slt, %28, %c0_i32_12 : i32
    %36 = vector.broadcast %35 : i1 to vector<8x1xi1>
    %37 = vector.broadcast %36 : vector<8x1xi1> to vector<8x1xi1>
    %38 = arith.xori %34, %37 : vector<8x1xi1>
    %39 = arith.andi %38, %32 : vector<8x1xi1>
    %40 = vector.broadcast %28 : i32 to vector<8x1xi32>
    %41 = arith.addi %30, %40 : vector<8x1xi32>
    %42 = arith.select %39, %41, %30 : vector<8x1xi1>, vector<8x1xi32>
    %c7_i32_13 = arith.constant 7 : i32
    %43 = vector.broadcast %c7_i32_13 : i32 to vector<8x1xi32>
    %44 = arith.cmpi eq, %42, %43 : vector<8x1xi32>
    %cst_14 = arith.constant 0.000000e+00 : f32
    %45 = vector.broadcast %cst_14 : f32 to vector<8x128xf32>
    %46 = vector.shape_cast %44 : vector<8x1xi1> to vector<8x1xi1>
    %47 = vector.broadcast %46 : vector<8x1xi1> to vector<8x128xi1>
    %48 = arith.select %47, %45, %4 : vector<8x128xi1>, vector<8x128xf32>
    %c1 = arith.constant 1 : index
    %c0_15 = arith.constant 0 : index
    %c0_16 = arith.constant 0 : index
    %49 = vector.load %arg2[%c1, %c0_15, %c0_16] : memref<3x128x128xf32, #tpu.memory_space<vmem>>, vector<1x128x128xf32>
    %50 = vector.shape_cast %49 : vector<1x128x128xf32> to vector<128x128xf32>
    %cst_17 = arith.constant dense<0.000000e+00> : vector<8x128xf32>
    %51 = tpu.matmul %1, %50, %cst_17 {dimension_numbers = #tpu.dot_dimension_numbers<[1], [0], [0], [1], [0, 0, 1, 1], [], []>} : vector<8x128xf32>, vector<128x128xf32>, vector<8x128xf32> -> vector<8x128xf32>
    %c0_18 = arith.constant 0 : index
    %c0_19 = arith.constant 0 : index
    %c0_20 = arith.constant 0 : index
    %52 = vector.load %arg2[%c0_18, %c0_19, %c0_20] : memref<3x128x128xf32, #tpu.memory_space<vmem>>, vector<1x128x128xf32>
    %53 = vector.shape_cast %52 : vector<1x128x128xf32> to vector<128x128xf32>
    %cst_21 = arith.constant dense<0.000000e+00> : vector<8x128xf32>
    %54 = tpu.matmul %26, %53, %cst_21 {dimension_numbers = #tpu.dot_dimension_numbers<[1], [0], [0], [1], [0, 0, 1, 1], [], []>} : vector<8x128xf32>, vector<128x128xf32>, vector<8x128xf32> -> vector<8x128xf32>
    %55 = arith.addf %51, %54 : vector<8x128xf32>
    %c2 = arith.constant 2 : index
    %c0_22 = arith.constant 0 : index
    %c0_23 = arith.constant 0 : index
    %56 = vector.load %arg2[%c2, %c0_22, %c0_23] : memref<3x128x128xf32, #tpu.memory_space<vmem>>, vector<1x128x128xf32>
    %57 = vector.shape_cast %56 : vector<1x128x128xf32> to vector<128x128xf32>
    %cst_24 = arith.constant dense<0.000000e+00> : vector<8x128xf32>
    %58 = tpu.matmul %48, %57, %cst_24 {dimension_numbers = #tpu.dot_dimension_numbers<[1], [0], [0], [1], [0, 0, 1, 1], [], []>} : vector<8x128xf32>, vector<128x128xf32>, vector<8x128xf32> -> vector<8x128xf32>
    %59 = arith.addf %55, %58 : vector<8x128xf32>
    %c0_25 = arith.constant 0 : index
    %c0_26 = arith.constant 0 : index
    %60 = vector.load %arg3[%c0_25, %c0_26] : memref<1x128xf32, #tpu.memory_space<vmem>>, vector<1x128xf32>
    %61 = vector.broadcast %60 : vector<1x128xf32> to vector<8x128xf32>
    %62 = arith.addf %59, %61 : vector<8x128xf32>
    %cst_27 = arith.constant 0.000000e+00 : f32
    %63 = vector.broadcast %cst_27 : f32 to vector<8x128xf32>
    %64 = arith.maximumf %62, %63 : vector<8x128xf32>
    %65 = vector.shape_cast %64 : vector<8x128xf32> to vector<1x8x128xf32>
    %c0_28 = arith.constant 0 : index
    %c0_29 = arith.constant 0 : index
    %c0_30 = arith.constant 0 : index
    %66 = vector.load %arg4[%c0_28, %c0_29, %c0_30] : memref<1x8x128xf32, #tpu.memory_space<vmem>>, vector<1x8x128xf32>
    tpu.vector_store %arg4[%c0_28, %c0_29, %c0_30], %65 {strides = array<i32>} : memref<1x8x128xf32, #tpu.memory_space<vmem>>, vector<1x8x128xf32>,
    return
  }
  func.func @transform_0(%arg0: i32) -> (i32, i32, i32) {
    %c0_i32 = arith.constant 0 : i32
    %c0_i32_0 = arith.constant 0 : i32
    %c0_i32_1 = arith.constant 0 : i32
    return %arg0, %c0_i32, %c0_i32_0 : i32, i32, i32
  }
  func.func @transform_1(%arg0: i32) -> (i32, i32, i32) {
    %c0_i32 = arith.constant 0 : i32
    %c0_i32_0 = arith.constant 0 : i32
    %c0_i32_1 = arith.constant 0 : i32
    %c0_i32_2 = arith.constant 0 : i32
    return %c0_i32, %c0_i32_0, %c0_i32_1 : i32, i32, i32
  }
  func.func @transform_2(%arg0: i32) -> (i32, i32) {
    %c0_i32 = arith.constant 0 : i32
    %c0_i32_0 = arith.constant 0 : i32
    %c0_i32_1 = arith.constant 0 : i32
    return %c0_i32, %c0_i32_0 : i32, i32
  }
  func.func @transform_3(%arg0: i32) -> (i32, i32, i32) {
    %c0_i32 = arith.constant 0 : i32
    %c0_i32_0 = arith.constant 0 : i32
    %c0_i32_1 = arith.constant 0 : i32
    return %arg0, %c0_i32, %c0_i32_0 : i32, i32, i32
  }
}

</mosaic_0001>

<bundles_post_ra>
// kernel: tpu_custom_call.1
= control target key start
LH: loop header
LB: loop body
LE: loop exit
PB: predicated region body
PF: predicated region fallthrough
CT: control target
= control target key end

     0   :  { %8 = vsyncpa [#allocation3], 0  ;;  %s1299_s0 = inlined_call_operand.hbm [shape: f32[2,8,128], index: 0, kind: input, shape index: {}]   ;;  %s1300_s1 = inlined_call_operand.hbm [shape: f32[3,128,128], index: 1, kind: input, shape index: {}]   ;;  %s1301_s2 = inlined_call_operand.vmem [shape: f32[1,128], index: 2, kind: input, shape index: {}]   ;;  %s1302_s3 = inlined_call_operand.hbm [shape: f32[2,8,128], index: 3, kind: output, shape index: {}]  }
   0x1   :  { %10 = vsyncpa [#allocation3 + $0x1], 0 }
   0x2   :  { %11 = vsyncpa [#allocation6], 0 }
   0x3   :  { %12 = vsyncpa [#allocation4], 0 }
   0x4   :  { %14 = vsyncpa [#allocation4 + $0x1], 0  ;;  %s1060_s12 = smov 0   ;;  %s1062_s13 = smov 0  }
   0x5   :  { %s1064_s14 = smov 0   ;;  %s1066_s15 = smov 0  }
   0x6 LB: > { %s1081_s16 = sadd.s32 4294967295, %s1030_s15   ;;  %s591_s17 = sadd.s32 4294967294, %s1030_s15   ;;  %s1030_s15 = sphi %s1066_s15, %s1322_s15   ;;  %s1026_s14 = sphi %s1064_s14, %s1321_s14   ;;  %s1022_s13 = sphi %s1062_s13, %s1320_s13   ;;  %s1018_s12 = sphi %s1060_s12, %s1319_s12  }
   0x7   : > { %p40_p0 = scmp.ne.s32.totalorder %s1022_s13, %s1018_s12  ;;  %p1303_p1 = scmp.eq.s32.totalorder %s1081_s16, 0 }
   0x8   : > { %p112_p3 = scmp.eq.s32.totalorder %s591_s17, 1  ;;  %p592_p5 = scmp.ge.s32.totalorder %s1030_s15, 1 }
   0x9   : > { %p1090_p4 = por %p1303_p1, %p40_p0  ;;  %p119_p7 = scmp.lt.s32.totalorder %s1030_s15, 3 }
   0xa   : > { %p1095_p6 = por %p112_p3, %p40_p0  ;;  %s1032_s21 = smov [#allocation5]  }
   0xb   : > { %s1306_s18 = scalar_select %p1090_p4, 1, 0 }
   0xc   : > { %s1307_s19 = scalar_select %p1095_p6, 1, 0 }
   0xd   : > { %p1100_p8 = pnand %p592_p5, %p119_p7  ;;  %s131_s22 = sshll.u32 %s1032_s21, 4  ;;  %s1104_s22 = int_to_ptr.vmem [resolvable:$true] %s131_s22 }
   0xe   : > { %s1116_s24 = sadd.s32 1, %s1030_s15   ;;  %s27_s25 = sadd.s32 1, %s1026_s14 }
   0xf   : > { %s1308_s20 = scalar_select %p1100_p8, 1, 0 }
  0x10   : > { %p848_p9 = pneg %p1100_p8  ;;  %s24_s26 = ssub.s32 %s1030_s15, %s1116_s24 }
  0x11   : > { %s902_s29 = scalar_lea.hbm %s1300_s1, 6144 }
  0x12   : > { %p1111_p11 = pnand %p848_p9, %p1303_p1  ;;  %p903_p12 = scmp.ne.s32.totalorder %s1300_s1, %s902_s29 }
  0x13   : > { %p909_p5 = scmp.lt.u32.totalorder %s902_s29, %s1300_s1 }
  0x14   : > { %p904_p13 = pneg %p1111_p11 }
  0x16   : > { %p905_p0 = pnand %p904_p13, %p903_p12 }
  0x18   : > { %p906_p3 = pneg %p905_p0 }
  0x1a   : > { %p911_p7 = pnand %p909_p5, %p906_p3 }
  0x1c   : > { %914 = shalt.err (!%p911_p7)
}
  0x1d   : > { %s915_s7 = scalar_lea.vmem %s1104_s22, 6144  ;;  %p923_p2 = scmp.lt.s32.totalorder %s1104_s22, %s1104_s22 }
  0x1e   : > { %p916_p9 = scmp.ne.s32.totalorder %s1104_s22, %s915_s7  ;;  %p924_p6 = scmp.lt.s32.totalorder %s915_s7, %s915_s7 }
  0x20   : > { %p918_p10 = pnand %p916_p9, %p904_p13  ;;  %p925_p4 = por %p924_p6, %p923_p2 }
  0x22   : > { %p919_p1 = pneg %p918_p10 }
  0x24   : > { %p926_p8 = pnand %p925_p4, %p919_p1 }
  0x26   : > { %929 = shalt.err (!%p926_p8)
}
  0x27   : > { %s1033_s8 = smov 128   ;;  %s1034_s9 = smov 8  }
  0x28   : > { %851 = dma.hbm_to_vmem [thread:$0]  (!%p1111_p11), %s1300_s1, 6144, %s1104_s22, [#allocation6], %s1033_s8, %s1033_s8, %s1034_s9  }
  0x29   : > { %p25_p2 = scmp.eq.s32.totalorder %s24_s26, 0  ;;  %p34_p1 = scmp.ne.s32.totalorder %s1026_s14, %s1022_s13 }
  0x2a   : > { %p35_p4 = scmp.eq.s32.totalorder %s1030_s15, 0  ;;  %p861_p6 = scmp.lt.s32.totalorder %s1030_s15, 2 }
  0x2b   : > { %s1147_s17 = scalar_select %p25_p2, %s1026_s14, %s27_s25  }
  0x2c   : > { %p36_p8 = por %p35_p4, %p34_p1  ;;  %p1310_p10 = scmp.eq.s32.totalorder %s1081_s16, 1 }
  0x2d   : > { %s148_s27 = sand.u32 1, %s1026_s14   ;;  %s596_s28 = sshll.u32 %s1030_s15, 7 }
  0x2e   : > { %p1151_p12 = por %p1310_p10, %p34_p1  ;;  %s595_s29 = sshll.u32 %s148_s27, 3 }
  0x2f   : > { %s1160_s4 = scalar_lea.hbm %s1299_s0, %s596_s28  ;;  %s152_s22 = scalar_lea.vmem [#allocation2], %s595_s29 }
  0x30   : > { %s159_s25 = sshll.u32 %s152_s22, 4  ;;  %p1162_p11 = pnand %p861_p6, %p36_p8  ;;  %s1166_s25 = int_to_ptr.vmem [resolvable:$true] %s159_s25 }
  0x31   : > { %s149_s5 = scalar_lea.sflag [#allocation3], %s148_s27  ;;  %s930_s6 = scalar_lea.hbm %s1160_s4, 128 }
  0x32   : > { %p931_p13 = scmp.ne.s32.totalorder %s1160_s4, %s930_s6  ;;  %p932_p0 = pneg %p1162_p11 }
  0x33   : > { %s935_s9 = scalar_lea.hbm %s1299_s0, 256  ;;  %p936_p7 = scmp.lt.u32.totalorder %s1160_s4, %s1299_s0 }
  0x34   : > { %p933_p3 = pnand %p932_p0, %p931_p13  ;;  %p937_p9 = scmp.lt.u32.totalorder %s935_s9, %s930_s6 }
  0x35   : > { %p939_p1 = scmp.lt.u32.totalorder %s930_s6, %s1160_s4 }
  0x36   : > { %p934_p5 = pneg %p933_p3  ;;  %p938_p2 = por %p937_p9, %p936_p7 }
  0x38   : > { %p940_p4 = por %p939_p1, %p938_p2 }
  0x3a   : > { %p941_p6 = pnand %p940_p4, %p934_p5 }
  0x3c   : > { %944 = shalt.err (!%p941_p6)
}
  0x3d   : > { %s945_s27 = scalar_lea.vmem %s1166_s25, 128  ;;  %s1035_s28 = smov [#allocation2]  }
  0x3e   : > { %p946_p8 = scmp.ne.s32.totalorder %s1166_s25, %s945_s27  ;;  %s950_s29 = sshll.u32 %s1035_s28, 4  ;;  %s951_s29 = int_to_ptr.vmem [resolvable:$false] %s950_s29 }
  0x3f   : > { %s952_s23 = scalar_lea.vmem %s951_s29, 256  ;;  %p953_p3 = scmp.lt.s32.totalorder %s1166_s25, %s951_s29 }
  0x40   : > { %p948_p10 = pnand %p946_p8, %p932_p0  ;;  %p954_p7 = scmp.lt.s32.totalorder %s952_s23, %s945_s27 }
  0x42   : > { %p949_p13 = pneg %p948_p10  ;;  %p955_p9 = por %p954_p7, %p953_p3 }
  0x44   : > { %p956_p2 = pnand %p955_p9, %p949_p13 }
  0x46   : > { %959 = shalt.err (!%p956_p2)
}
  0x47   : > { %855 = dma.hbm_to_vmem [thread:$0]  (!%p1162_p11), %s1160_s4, 128, %s1166_s25, %s149_s5  }
  0x48   : > { %p1313_p5 = scmp.ne.s32.totalorder %s1308_s20, 0 }
  0x49   : > { %s1196_s30 = sand.u32 (!%p1313_p5), 1, %s1022_s13   ;;  %p1314_p0 = scmp.ne.s32.totalorder (!%p1313_p5), %s1306_s18, 0 }
  0x4a   : > { %168 = sbr.rel (%p1313_p5) target bundleno = 383 (0x17f), region = 32  ;;  %s598_s22 = sshll.u32 (!%p1313_p5), %s1196_s30, 3 }
  0x4b   : > { %s171_s6 = scalar_lea.sflag (!%p1313_p5), [#allocation3], %s1196_s30  ;;  %s1202_s7 = scalar_lea.vmem (!%p1313_p5), [#allocation2], %s598_s22 }
  0x51   : > { %1005 = dma.done.wait (%p1314_p0), %s171_s6, 128  }
  0x52   : > { %1007 = vsyncadd (%p1314_p0), %s171_s6, 4294967168  ;;  %p1315_p11 = scmp.eq.s32.totalorder %s1081_s16, 0 }
  0x54   : > { %1009 = dma.done.wait (%p1315_p11), [#allocation6], 6144   ;;  %p1316_p1 = pmov %p1315_p11 }
  0x55   : > { %v1036_v0 = vmov 0.0|0.0   ;;  %vm1037_vm0 = vmmov 0   ;;  %v1038_v1 = vmov 0.0   ;;  %v243_v2 = vld [vmem:[#allocation5] sm:$0xff]  ;;  %v244_v3 = vld [vmem:[#allocation5 + $0x8] sm:$0xff]  ;;  %v245_v7 = vld [vmem:[#allocation5 + $0x10] sm:$0xff]  ;;  %v202_v37 = vlaneseq }
  0x56   : > { %1011 = vsyncadd (%p1316_p1), [#allocation6], 4294961152  ;;  %768 = vmatprep.subr.bf16.mxu0 %v1036_v0  ;;  %792 = vmatprep.subr.bf16.mxu1 %v1036_v0  ;;  %v227_v4 = vld [vmem:[#allocation5 + $0x80] sm:$0xff]  ;;  %v769_v5 = vpack.c.bf16 %v244_v3, %v243_v2  ;;  %v228_v6 = vld [vmem:[#allocation5 + $0x88] sm:$0xff]  ;;  %s607_s4 = sshll.u32 %s1081_s16, 7  ;;  %s200_s25 = scalar_lea.vmem [#allocation7], %s598_s22 }
  0x57   : > { %695 = vmatprep.mubr.msk.f32.mxu0 %vm1037_vm0, %v1038_v1  ;;  %730 = vmatprep.mubr.msk.f32.mxu1 %vm1037_vm0, %v1038_v1  ;;  %v246_v8 = vld [vmem:[#allocation5 + $0x18] sm:$0xff]  ;;  %v793_v9 = vpack.c.bf16 %v228_v6, %v227_v4  ;;  %v229_v10 = vld [vmem:[#allocation5 + $0x90] sm:$0xff]  ;;  %v247_v14 = vld [vmem:[#allocation5 + $0x20] sm:$0xff]  ;;  %v1228_v44 = vshrl.u32 %v202_v37, 7  ;;  %s511_s26 = sshll.u32 %s200_s25, 4  ;;  %s1255_s9 = scalar_lea.hbm %s1302_s3, %s607_s4  ;;  %s1257_s26 = int_to_ptr.vmem [resolvable:$true] %s511_s26 }
  0x58   : > { %v230_v11 = vld [vmem:[#allocation5 + $0x98] sm:$0xff]  ;;  %770 = vmatpush3.bf16.msra.mxu0 %v769_v5  ;;  %v772_v12 = vpack.c.bf16 %v246_v8, %v245_v7  ;;  %v248_v15 = vld [vmem:[#allocation5 + $0x28] sm:$0xff]  ;;  %v231_v16 = vld [vmem:[#allocation5 + $0xa0] sm:$0xff]  ;;  %s498_s10 = scalar_lea.sflag [#allocation4], %s1196_s30  ;;  %s960_s11 = scalar_lea.vmem %s1257_s26, 128 }
  0x59   : > { %794 = vmatpush3.bf16.msra.mxu1 %v793_v9  ;;  %771 = vmatprep.subr.bf16.mxu0 %v1036_v0  ;;  %v796_v13 = vpack.c.bf16 %v230_v11, %v229_v10  ;;  %v232_v17 = vld [vmem:[#allocation5 + $0xa8] sm:$0xff]  ;;  %v775_v18 = vpack.c.bf16 %v248_v15, %v247_v14  ;;  %v249_v20 = vld [vmem:[#allocation5 + $0x30] sm:$0xff]  ;;  %v250_v21 = vld [vmem:[#allocation5 + $0x38] sm:$0xff]  ;;  %v210_v52 = vand.u32 7, %v1228_v44  ;;  %p961_p4 = scmp.ne.s32.totalorder %s1257_s26, %s960_s11  ;;  %s1039_s16 = smov [#allocation7]  }
  0x5a   : > { %795 = vmatprep.subr.bf16.mxu1 %v1036_v0  ;;  %v799_v19 = vpack.c.bf16 %v232_v17, %v231_v16  ;;  %v233_v22 = vld [vmem:[#allocation5 + $0xb0] sm:$0xff]  ;;  %v234_v23 = vld [vmem:[#allocation5 + $0xb8] sm:$0xff]  ;;  %v778_v24 = vpack.c.bf16 %v250_v21, %v249_v20  ;;  %v251_v26 = vld [vmem:[#allocation5 + $0x40] sm:$0xff]  ;;  %s964_s27 = sshll.u32 %s1039_s16, 4  ;;  %s965_s27 = int_to_ptr.vmem [resolvable:$false] %s964_s27 }
  0x5b   : > { %v802_v25 = vpack.c.bf16 %v234_v23, %v233_v22  ;;  %v252_v27 = vld [vmem:[#allocation5 + $0x48] sm:$0xff]  ;;  %v235_v28 = vld [vmem:[#allocation5 + $0xc0] sm:$0xff]  ;;  %v253_v32 = vld [vmem:[#allocation5 + $0x50] sm:$0xff]  ;;  %vm610_vm1 = vcmp.ne.s32.totalorder %v210_v52, 0  ;;  %vm611_vm2 = vcmp.ne.s32.totalorder %v210_v52, 7  ;;  %p962_p6 = pnand %p961_p4, %p1151_p12  ;;  %s966_s28 = scalar_lea.vmem %s965_s27, 256 }
  0x5c   : > { %773 = vmatpush3.bf16.msra.mxu0 %v772_v12  ;;  %v236_v29 = vld [vmem:[#allocation5 + $0xc8] sm:$0xff]  ;;  %v781_v30 = vpack.c.bf16 %v252_v27, %v251_v26  ;;  %v254_v33 = vld [vmem:[#allocation5 + $0x58] sm:$0xff]  ;;  %v237_v34 = vld [vmem:[#allocation5 + $0xd0] sm:$0xff]  ;;  %p967_p10 = scmp.lt.s32.totalorder %s1257_s26, %s965_s27  ;;  %p968_p13 = scmp.lt.s32.totalorder %s966_s28, %s960_s11 }
  0x5d   : > { %797 = vmatpush3.bf16.msra.mxu1 %v796_v13  ;;  %774 = vmatprep.subr.bf16.mxu0 %v1036_v0  ;;  %v805_v31 = vpack.c.bf16 %v236_v29, %v235_v28  ;;  %v238_v35 = vld [vmem:[#allocation5 + $0xd8] sm:$0xff]  ;;  %v784_v36 = vpack.c.bf16 %v254_v33, %v253_v32  ;;  %v255_v39 = vld [vmem:[#allocation5 + $0x60] sm:$0xff]  ;;  %v256_v40 = vld [vmem:[#allocation5 + $0x68] sm:$0xff]  ;;  %p963_p8 = pneg %p962_p6 }
  0x5e   : > { %798 = vmatprep.subr.bf16.mxu1 %v1036_v0  ;;  %v808_v38 = vpack.c.bf16 %v238_v35, %v237_v34  ;;  %v239_v41 = vld [vmem:[#allocation5 + $0xe0] sm:$0xff]  ;;  %v240_v42 = vld [vmem:[#allocation5 + $0xe8] sm:$0xff]  ;;  %v787_v43 = vpack.c.bf16 %v256_v40, %v255_v39  ;;  %v257_v46 = vld [vmem:[#allocation5 + $0x70] sm:$0xff]  ;;  %p969_p3 = por %p968_p13, %p967_p10 }
  0x5f   : > { %v811_v45 = vpack.c.bf16 %v240_v42, %v239_v41  ;;  %v258_v47 = vld [vmem:[#allocation5 + $0x78] sm:$0xff]  ;;  %v241_v48 = vld [vmem:[#allocation5 + $0xf0] sm:$0xff]  ;;  %v400_v54 = vld [vmem:[#allocation5 + $0x100] sm:$0xff] }
  0x60   : > { %776 = vmatpush3.bf16.msra.mxu0 %v775_v18  ;;  %v242_v49 = vld [vmem:[#allocation5 + $0xf8] sm:$0xff]  ;;  %v790_v50 = vpack.c.bf16 %v258_v47, %v257_v46  ;;  %v401_v55 = vld [vmem:[#allocation5 + $0x108] sm:$0xff]  ;;  %v402_v58 = vld [vmem:[#allocation5 + $0x110] sm:$0xff]  ;;  %p970_p7 = pnand %p969_p3, %p963_p8 }
  0x61   : > { %800 = vmatpush3.bf16.msra.mxu1 %v799_v19  ;;  %777 = vmatprep.subr.bf16.mxu0 %v1036_v0  ;;  %v201_v51 = vld [vmem:[%s1202_s7] sm:$0xff]  ;;  %v814_v53 = vpack.c.bf16 %v242_v49, %v241_v48  ;;  %v817_v57 = vpack.c.bf16 %v401_v55, %v400_v54  ;;  %v404_v61 = vld [vmem:[#allocation5 + $0x120] sm:$0xff]  ;;  %v405_v62 = vld [vmem:[#allocation5 + $0x128] sm:$0xff] }
  0x62   : > { %801 = vmatprep.subr.bf16.mxu1 %v1036_v0  ;;  %v204_v56 = vrot.slane %v201_v51, 7  ;;  %v403_v59 = vld [vmem:[#allocation5 + $0x118] sm:$0xff]  ;;  %v823_v63 = vpack.c.bf16 %v405_v62, %v404_v61  ;;  %v406_v2 = vld [vmem:[#allocation5 + $0x130] sm:$0xff]  ;;  %v408_v5 = vld [vmem:[#allocation5 + $0x140] sm:$0xff]  ;;  %v205_v16 = vrot.slane %v201_v51, 1 }
  0x63   : > { %v820_v60 = vpack.c.bf16 %v403_v59, %v402_v58  ;;  %v407_v3 = vld [vmem:[#allocation5 + $0x138] sm:$0xff]  ;;  %v409_v6 = vld [vmem:[#allocation5 + $0x148] sm:$0xff]  ;;  %v410_v8 = vld [vmem:[#allocation5 + $0x150] sm:$0xff] }
  0x64   : > { %779 = vmatpush3.bf16.msra.mxu0 %v778_v24  ;;  %v826_v4 = vpack.c.bf16 %v407_v3, %v406_v2  ;;  %v829_v7 = vpack.c.bf16 %v409_v6, %v408_v5  ;;  %v411_v9 = vld [vmem:[#allocation5 + $0x158] sm:$0xff]  ;;  %v412_v10 = vld [vmem:[#allocation5 + $0x160] sm:$0xff]  ;;  %v413_v11 = vld [vmem:[#allocation5 + $0x168] sm:$0xff] }
  0x65   : > { %803 = vmatpush3.bf16.msra.mxu1 %v802_v25  ;;  %780 = vmatprep.subr.bf16.mxu0 %v1036_v0  ;;  %v835_v12 = vpack.c.bf16 %v413_v11, %v412_v10  ;;  %v414_v13 = vld [vmem:[#allocation5 + $0x170] sm:$0xff]  ;;  %v415_v14 = vld [vmem:[#allocation5 + $0x178] sm:$0xff] }
  0x66   : > { %804 = vmatprep.subr.bf16.mxu1 %v1036_v0  ;;  %v838_v15 = vpack.c.bf16 %v415_v14, %v414_v13  ;;  %v605_v23 = vld [vmem:[%s1301_s2] ss:$0 sm:$0xff] }
  0x68   : > { %782 = vmatpush3.bf16.msra.mxu0 %v781_v30 }
  0x69   : > { %806 = vmatpush3.bf16.msra.mxu1 %v805_v31  ;;  %783 = vmatprep.subr.bf16.mxu0 %v1036_v0 }
  0x6a   : > { %807 = vmatprep.subr.bf16.mxu1 %v1036_v0 }
  0x6c   : > { %785 = vmatpush3.bf16.msra.mxu0 %v784_v36 }
  0x6d   : > { %809 = vmatpush3.bf16.msra.mxu1 %v808_v38  ;;  %786 = vmatprep.subr.bf16.mxu0 %v1036_v0 }
  0x6e   : > { %810 = vmatprep.subr.bf16.mxu1 %v1036_v0 }
  0x70   : > { %788 = vmatpush3.bf16.msra.mxu0 %v787_v43 }
  0x71   : > { %812 = vmatpush3.bf16.msra.mxu1 %v811_v45  ;;  %789 = vmatprep.subr.bf16.mxu0 %v1036_v0 }
  0x72   : > { %813 = vmatprep.subr.bf16.mxu1 %v1036_v0 }
  0x74   : > { %791 = vmatpush3.bf16.msra.mxu0 %v790_v50 }
  0x75   : > { %815 = vmatpush3.bf16.msra.mxu1 %v814_v53  ;;  %816 = vmatprep.subr.bf16.mxu0 %v1036_v0 }
  0x77   : > { %696 = vmatmul.mubr.msk.f32.vlgmr.msra.gmra.mrb[0].mxu0 %vm610_vm1, %v204_v56 }
  0x78   : > { %731 = vmatmul.mubr.f32.vlgmr.msra.gmra.mrb[0].mxu1 %v201_v51  ;;  %818 = vmatpush3.bf16.msra.mxu0 %v817_v57 }
  0x79   : > { %819 = vmatprep.subr.bf16.mxu0 %v1036_v0  ;;  %765 = vmatprep.mubr.msk.f32.mxu0 %vm1037_vm0, %v1038_v1  ;;  %v832_v1 = vpack.c.bf16 %v411_v9, %v410_v8 }
  0x7c   : > { %821 = vmatpush3.bf16.msra.mxu0 %v820_v60 }
  0x7d   : > { %822 = vmatprep.subr.bf16.mxu0 %v1036_v0 }
  0x80   : > { %824 = vmatpush3.bf16.msra.mxu0 %v823_v63 }
  0x81   : > { %825 = vmatprep.subr.bf16.mxu0 %v1036_v0 }
  0x84   : > { %827 = vmatpush3.bf16.msra.mxu0 %v826_v4 }
  0x85   : > { %828 = vmatprep.subr.bf16.mxu0 %v1036_v0 }
  0x88   : > { %830 = vmatpush3.bf16.msra.mxu0 %v829_v7 }
  0x89   : > { %831 = vmatprep.subr.bf16.mxu0 %v1036_v0 }
  0x8c   : > { %833 = vmatpush3.bf16.msra.mxu0 %v832_v1 }
  0x8d   : > { %834 = vmatprep.subr.bf16.mxu0 %v1036_v0 }
  0x90   : > { %836 = vmatpush3.bf16.msra.mxu0 %v835_v12 }
  0x91   : > { %837 = vmatprep.subr.bf16.mxu0 %v1036_v0 }
  0x94   : > { %839 = vmatpush3.bf16.msra.mxu0 %v838_v15 }
  0x97   : > { %766 = vmatmul.mubr.msk.f32.vlgmr.msra.gmra.mrb[2].mxu0 %vm611_vm2, %v205_v16 }
 0x14a   : > { %v325_v17 = vpop.f32.mrb[0].mxu0 }
 0x14b   : > { %v697_v18 = vpop.f32.mrb[1].mxu0  ;;  %v395_v19 = vpop.f32.mrb[0].mxu1 }
 0x14c   : > { %v396_v20 = vadd.f32 %v395_v19, %v325_v17  ;;  %v732_v21 = vpop.f32.mrb[1].mxu1 }
 0x16a   : > { %v482_v22 = vpop.f32.mrb[2].mxu0 }
 0x16b   : > { %v486_v24 = vadd.f32 %v482_v22, %v396_v20  ;;  %v767_v25 = vpop.f32.mrb[3].mxu0 }
 0x16d   : > { %v494_v0 = vadd.f32 %v605_v23, %v486_v24 }
 0x16f   : > { %v495_v26 = vmax.f32 %v494_v0, 0.0 }
 0x171   : > { %496 = vst [vmem:[%s200_s25] sm:$0xff] %v495_v26 }
 0x172   : > { %973 = shalt.err (!%p970_p7)
}
 0x173   : > { %s974_s29 = scalar_lea.hbm %s1255_s9, 128  ;;  %s978_s22 = scalar_lea.hbm %s1302_s3, 256 }
 0x174   : > { %p975_p9 = scmp.ne.s32.totalorder %s1255_s9, %s974_s29  ;;  %p979_p0 = scmp.lt.u32.totalorder %s1255_s9, %s1302_s3 }
 0x175   : > { %p980_p11 = scmp.lt.u32.totalorder %s978_s22, %s974_s29  ;;  %p982_p4 = scmp.lt.u32.totalorder %s974_s29, %s1255_s9 }
 0x176   : > { %p976_p2 = pnand %p975_p9, %p1151_p12 }
 0x177   : > { %p981_p1 = por %p980_p11, %p979_p0 }
 0x178   : > { %p977_p5 = pneg %p976_p2 }
 0x179   : > { %p983_p6 = por %p982_p4, %p981_p1 }
 0x17b   : > { %p984_p8 = pnand %p983_p6, %p977_p5 }
 0x17d   : > { %987 = shalt.err (!%p984_p8)
}
 0x17e   : > { %846 = dma.vmem_to_hbm [thread:$0]  (%p1151_p12), %s1257_s26, 128, %s1255_s9, %s498_s10  }
 0x17f PF: > { %s523_s18 = sand.u32 1, %s1018_s12   ;;  %p1317_p10 = scmp.ne.s32.totalorder %s1307_s19, 0 }
 0x180   : > { %p1318_p13 = scmp.ge.s32.totalorder %s1030_s15, 2  ;;  %s524_s20 = scalar_lea.sflag [#allocation4], %s523_s18 }
 0x182   : > { %p857_p3 = pnand %p1318_p13, %p1317_p10 }
 0x184   : > { %1013 = dma.done.wait (!%p857_p3), %s524_s20, 128  }
 0x185   : > { %1015 = vsyncadd (!%p857_p3), %s524_s20, 4294967168  ;;  %p17_p7 = scmp.ge.s32.totalorder %s1116_s24, 4   ;;  %s1319_s12 = smov %s1022_s13 }
 0x186   : > { %s1320_s13 = smov %s1026_s14  ;;  %s1321_s14 = smov %s1147_s17 }
 0x187   : > { %s1322_s15 = smov %s1116_s24  ;;  %19 = sbr.rel (!%p17_p7) target bundleno = 6 (0x6), region = 83 }
 0x18e   :  { %529 = vsyncpa [#allocation3], 1 }
 0x18f   :  { %531 = vsyncpa [#allocation3 + $0x1], 1 }
 0x190   :  { %532 = vsyncpa [#allocation6], 1 }
 0x191   :  { %533 = vsyncpa [#allocation4], 1 }
 0x192   :  { %535 = vsyncpa [#allocation4 + $0x1], 1 }

</bundles_post_ra>
